<compile_context>
chip_gen: v6e
topology: v6e:2x2x1
jax: 0.10.0
libtpu: 0.0.40
codegen_flags: <defaults>
</compile_context>

<pallas_src>
import jax
import jax.numpy as jnp
from jax.experimental import pallas as pl
from jax.experimental.pallas import tpu as pltpu


def _round_up(n, m):
    return (n + m - 1) // m * m


def _round_down_floor(n, m):
    return max(m, n // m * m)


def classifier_kernel(x_ref, w_ref, b_ref, mask_ref, o_ref):
    # x_ref:    (T, H)  streamed tile of flattened activations (input dtype)
    # w_ref:    (H, 1)  linear1.weight, resident across grid steps (x dtype)
    # b_ref:    (1,)    linear1.bias, f32 scalar in SMEM
    # mask_ref: (T, 1)  mask tile (compact dtype, cast in-kernel)
    # o_ref:    (T, 1)  f32 sentence scores
    h = jnp.dot(x_ref[...], w_ref[...],
                preferred_element_type=jnp.float32)           # (T, 1), MXU, f32 acc
    h = h + b_ref[0]                                           # bias from SMEM
    scores = jax.nn.sigmoid(h) * mask_ref[...].astype(jnp.float32)
    o_ref[...] = scores.astype(o_ref.dtype)


def _vmem_limit_bytes():
    """~75% of physical VMEM (capped at 96 MiB): ~48 MiB v7x, ~96 MiB v5e/v6e."""
    cap = 64 * 1024 * 1024  # conservative fallback = v7x physical
    try:
        info = pltpu.get_tpu_info()
        c = getattr(info, "vmem_capacity_bytes", None)
        if c:
            cap = int(c)
    except Exception:
        pass
    return min(int(cap * 3) // 4, 96 * 1024 * 1024)


def classifier_forward(x, w, b, mask_cls, *,
                       max_rows_per_tile=8192,
                       target_min_blocks=2):
    """x: (B,S,H), w: (H,), b: (), mask_cls: (B,S) -> sent_scores (B,S) f32."""
    B, S, H = x.shape
    N = B * S

    x_flat = x.reshape(N, H)                       # leading-dim collapse: no copy
    w_col = w.reshape(H, 1).astype(x.dtype)        # tiny; match x dtype for one MXU dot
    b_vec = jnp.asarray(b, jnp.float32).reshape(1)

    mask2 = mask_cls.reshape(N, 1)
    if jnp.issubdtype(mask2.dtype, jnp.floating):
        mask2 = mask2.astype(jnp.float32)          # exact parity with mask_cls.float()
    else:
        mask2 = mask2.astype(jnp.int8)             # 0/1 mask: quarter the padded footprint

    # dtype-native sublane multiple for the x tile (f32:8, bf16:16, int8/fp8:32).
    sub = max(8, 32 // max(x.dtype.itemsize, 1))

    vmem_limit = _vmem_limit_bytes()
    tile_budget = (vmem_limit * 3) // 5            # ~60% of limit for the pipelined tiles

    # Per-row VMEM cost of the double-buffered working set.  (T,1) buffers are
    # lane-padded: each row costs a full 128-lane row (128 * itemsize bytes).
    per_row = (2 * H * x.dtype.itemsize            # x tile, double-buffered
               + 2 * 128 * mask2.dtype.itemsize    # mask tile (padded), double-buffered
               + 2 * 128 * 4)                      # f32 output tile (padded), double-buffered

    t_cap = _round_down_floor(tile_budget // max(per_row, 1), sub)
    T = min(max_rows_per_tile, t_cap)
    # Keep >= target_min_blocks grid blocks so v7x's second TensorCore gets work
    # (raise target_min_blocks for finer cross-core load balance at slightly
    #  higher per-step overhead).
    T = min(T, _round_up(pl.cdiv(N, target_min_blocks), sub))
    T = max(sub, min(T, _round_up(N, sub)))

    grid = (pl.cdiv(N, T),)   # ragged last tile: OOB rows read garbage but their
                              # outputs are dropped, so results are correct.

    cost = pl.CostEstimate(
        flops=2 * N * H,
        transcendentals=N,
        bytes_accessed=(N * H * x.dtype.itemsize      # x read
                        + H * x.dtype.itemsize        # weight read
                        + N * mask2.dtype.itemsize    # mask read
                        + N * 4),                     # f32 output write
    )

    out = pl.pallas_call(
        classifier_kernel,
        out_shape=jax.ShapeDtypeStruct((N, 1), jnp.float32),
        grid=grid,
        in_specs=[
            pl.BlockSpec((T, H), lambda i: (i, 0)),                   # x: streamed
            pl.BlockSpec((H, 1), lambda i: (0, 0)),                   # w: resident
            pl.BlockSpec(memory_space=pltpu.MemorySpace.SMEM),        # b: SMEM scalar
            pl.BlockSpec((T, 1), lambda i: (i, 0)),                   # mask
        ],
        out_specs=pl.BlockSpec((T, 1), lambda i: (i, 0)),
        compiler_params=pltpu.CompilerParams(
            dimension_semantics=("parallel",),
            vmem_limit_bytes=vmem_limit,
        ),
        cost_estimate=cost,
    )(x_flat, w_col, b_vec, mask2)

    return out.reshape(B, S)


if __name__ == "__main__":
    B, S, H = 2, 8, 32  # batch, number of sentence/[CLS] positions, hidden_size

    key = jax.random.PRNGKey(0)
    kx, kw, kb, km = jax.random.split(key, 4)

    # Parameters matching nn.Linear(hidden_size, 1) shapes.
    bound = 1.0 / (H ** 0.5)
    w = jax.random.uniform(kw, (H,), jnp.float32, minval=-bound, maxval=bound)
    b = jax.random.uniform(kb, (), jnp.float32, minval=-bound, maxval=bound)

    x = jax.random.normal(kx, (B, S, H), jnp.float32)
    mask_cls = (jax.random.uniform(km, (B, S)) > 0.3).astype(jnp.int32)

    out = classifier_forward(x, w, b, mask_cls)
    out = jax.block_until_ready(out)

    # Reference (same semantics as the PyTorch module).
    ref = jax.nn.sigmoid(x @ w + b) * mask_cls.astype(jnp.float32)
    assert out.shape == (B, S)
    assert jnp.allclose(out, ref, atol=1e-5, rtol=1e-5)

    print("KERNEL_OK")
</pallas_src>

<mosaic_0001>
module attributes {stable_mosaic.version = 11 : i64} {
  func.func @classifier_kernel(%arg0: i32, %arg1: memref<8x32xf32, #tpu.memory_space<vmem>>, %arg2: memref<32x1xf32, #tpu.memory_space<vmem>>, %arg3: memref<1xf32, #tpu.memory_space<smem>>, %arg4: memref<8x1xi8, #tpu.memory_space<vmem>>, %arg5: memref<8x1xf32, #tpu.memory_space<vmem>>) attributes {dimension_semantics = [#tpu.dimension_semantics<parallel>], iteration_bounds = array<i64: 2>, scalar_prefetch = 0 : i64, scratch_operands = 0 : i64, tpu.core_type = #tpu.core_type<tc>, window_params = [{transform_indices = @transform_0, window_bounds = array<i64: 8, 32>}, {pipeline_mode = #tpu.pipeline_mode<synchronous>, transform_indices = @transform_1, window_bounds = array<i64: 32, 1>}, {transform_indices = @transform_2, window_bounds = array<i64: 1>}, {transform_indices = @transform_3, window_bounds = array<i64: 8, 1>}, {transform_indices = @transform_4, window_bounds = array<i64: 8, 1>}]} {
    %c0 = arith.constant 0 : index
    %c0_0 = arith.constant 0 : index
    %0 = vector.load %arg1[%c0, %c0_0] : memref<8x32xf32, #tpu.memory_space<vmem>>, vector<8x32xf32>
    %c0_1 = arith.constant 0 : index
    %c0_2 = arith.constant 0 : index
    %1 = vector.load %arg2[%c0_1, %c0_2] : memref<32x1xf32, #tpu.memory_space<vmem>>, vector<32x1xf32>
    %cst = arith.constant dense<0.000000e+00> : vector<8x1xf32>
    %2 = tpu.matmul %0, %1, %cst {dimension_numbers = #tpu.dot_dimension_numbers<[1], [0], [0], [1], [0, 0, 1, 1], [], []>} : vector<8x32xf32>, vector<32x1xf32>, vector<8x1xf32> -> vector<8x1xf32>
    %c0_3 = arith.constant 0 : index
    %3 = memref.load %arg3[%c0_3] : memref<1xf32, #tpu.memory_space<smem>>
    %4 = vector.broadcast %3 : f32 to vector<8x1xf32>
    %5 = arith.addf %2, %4 : vector<8x1xf32>
    %6 = arith.negf %5 : vector<8x1xf32>
    %7 = math.exp %6 : vector<8x1xf32>
    %cst_4 = arith.constant 1.000000e+00 : f32
    %8 = vector.broadcast %cst_4 : f32 to vector<8x1xf32>
    %9 = arith.addf %8, %7 : vector<8x1xf32>
    %10 = arith.divf %8, %9 : vector<8x1xf32>
    %c0_5 = arith.constant 0 : index
    %c0_6 = arith.constant 0 : index
    %11 = vector.load %arg4[%c0_5, %c0_6] : memref<8x1xi8, #tpu.memory_space<vmem>>, vector<8x1xi8>
    %12 = arith.sitofp %11 : vector<8x1xi8> to vector<8x1xf32>
    %13 = arith.mulf %10, %12 : vector<8x1xf32>
    %c0_7 = arith.constant 0 : index
    %c0_8 = arith.constant 0 : index
    %14 = vector.load %arg5[%c0_7, %c0_8] : memref<8x1xf32, #tpu.memory_space<vmem>>, vector<8x1xf32>
    tpu.vector_store %arg5[%c0_7, %c0_8], %13 {strides = array<i32>} : memref<8x1xf32, #tpu.memory_space<vmem>>, vector<8x1xf32>,
    return
  }
  func.func @transform_0(%arg0: i32) -> (i32, i32) {
    %c0_i32 = arith.constant 0 : i32
    %c0_i32_0 = arith.constant 0 : i32
    return %arg0, %c0_i32 : i32, i32
  }
  func.func @transform_1(%arg0: i32) -> (i32, i32) {
    %c0_i32 = arith.constant 0 : i32
    %c0_i32_0 = arith.constant 0 : i32
    %c0_i32_1 = arith.constant 0 : i32
    return %c0_i32, %c0_i32_0 : i32, i32
  }
  func.func @transform_2(%arg0: i32) -> i32 {
    %c0_i32 = arith.constant 0 : i32
    %c0_i32_0 = arith.constant 0 : i32
    return %c0_i32 : i32
  }
  func.func @transform_3(%arg0: i32) -> (i32, i32) {
    %c0_i32 = arith.constant 0 : i32
    %c0_i32_0 = arith.constant 0 : i32
    return %arg0, %c0_i32 : i32, i32
  }
  func.func @transform_4(%arg0: i32) -> (i32, i32) {
    %c0_i32 = arith.constant 0 : i32
    %c0_i32_0 = arith.constant 0 : i32
    return %arg0, %c0_i32 : i32, i32
  }
}

</mosaic_0001>

<bundles_post_ra>
// kernel: tpu_custom_call.1
= control target key start
LH: loop header
LB: loop body
LE: loop exit
PB: predicated region body
PF: predicated region fallthrough
CT: control target
= control target key end

     0   :  { %s449_s17 = smov 0   ;;  %s485_s0 = inlined_call_operand.vmem [shape: f32[16,32], index: 0, kind: input, shape index: {}]   ;;  %s486_s1 = inlined_call_operand.vmem [shape: f32[32,1], index: 1, kind: input, shape index: {}]   ;;  %s487_s2 = inlined_call_operand.<no memory space> [shape: f32[1], index: 2, kind: input, shape index: {}]   ;;  %s488_s3 = inlined_call_operand.vmem [shape: s8[16,1], index: 3, kind: input, shape index: {}]   ;;  %s489_s4 = inlined_call_operand.vmem [shape: f32[16,1], index: 4, kind: output, shape index: {}]  }
   0x1   :  { %9 = sst [smem:[#allocation2]] %s487_s2 }
   0x2 LB: > { %s369_s18 = sadd.s32 4294967295, %s417_s17   ;;  %p373_p0 = scmp.ge.s32.totalorder %s417_s17, 1  ;;  %s417_s17 = sphi %s449_s17, %s15_s17  }
   0x3   : > { %p171_p1 = scmp.lt.s32.totalorder %s417_s17, 3 }
   0x5   : > { %p172_p2 = pnand %p373_p0, %p171_p1 }
   0x6   : > { %p199_p3 = scmp.lt.s32.totalorder (!%p172_p2), %s369_s18, 1  ;;  %s216_s30 = sld [smem:[#allocation2]] (!%p172_p2) }
   0x7   : > { %175 = sbr.rel (%p172_p2) target bundleno = 251 (0xfb), region = 36 }
   0xc   : > { %v215_v0 = vld [vmem:[%s486_s1 + $0x18] sm:$0xff]  ;;  %v419_v1 = vmov 0.0   ;;  %v214_v2 = vld [vmem:[%s486_s1 + $0x10] sm:$0xff]  ;;  %vm420_vm0 = vmmov 0   ;;  %s491_s18 = smov (!%p199_p3, %s369_s18), 1  ;;  %v213_v3 = vld [vmem:[%s486_s1 + $0x8] sm:$0xff]  ;;  %v217_v6 = vstv %s216_s30 }
   0xd   : > { %386 = vmatprep.subr.mxu0 %v419_v1  ;;  %394 = vmatprep.mubr.msk.f32.mxu0 %vm420_vm0, %v419_v1  ;;  %s374_s24 = sshll.u32 %s491_s18, 3  ;;  %v212_v4 = vld [vmem:[%s486_s1] sm:$0xff]  ;;  %vm218_vm1 = vcmask 261120   ;;  %s375_s5 = sshll.u32 %s491_s18, 1  ;;  %vm302_vm2 = vcmask 7168  }
   0xe   : > { %387 = vmatpush3.msra.mxu0 %v215_v0  ;;  %s202_s29 = scalar_lea.vmem %s485_s0, %s374_s24  ;;  %s206_s8 = scalar_lea.vmem %s488_s3, %s375_s5 }
   0xf   : > { %388 = vmatprep.subr.mxu0 %v419_v1  ;;  %v211_v5 = vld [vmem:[%s202_s29] sm:$0xff]  ;;  %s210_s11 = scalar_lea.vmem %s489_s4, %s374_s24 }
  0x10   : > { %389 = vmatpush3.msra.mxu0 %v214_v2  ;;  %v298_v13 = vld [vmem:[%s206_s8] sm:$0x3] }
  0x11   : > { %390 = vmatprep.subr.mxu0 %v419_v1  ;;  %v299_v14 = vunpack.c.0.s8 %v298_v13 }
  0x12   : > { %391 = vmatpush3.msra.mxu0 %v213_v3 }
  0x13   : > { %392 = vmatprep.subr.mxu0 %v419_v1  ;;  %v300_v15 = vcvt.s32.f32 %v299_v14 }
  0x14   : > { %393 = vmatpush3.msra.mxu0 %v212_v4 }
  0x15   : > { %395 = vmatmul.mubr.msk.f32.vlgmr.msra.gmra.mxu0 %vm218_vm1, %v211_v5 }
  0xd5   : > { %v288_v7 = vpop.f32.mrf.mxu0 }
  0xd6   : > { %v289_v8 = vadd.f32 %v288_v7, %v217_v6 }
  0xd7   : > { %v396_v9 = vpop.f32.mrf.mxu0 }
  0xd8   : > { %v378_v10 = vmul.f32 -1.442695, %v289_v8 }
  0xda   : > { %407 = vpow2.f32 %v378_v10 }
  0xe7   : > { %v408_v11 = vpop.eup %407 }
  0xe8   : > { %v295_v12 = vadd.f32 1.0, %v408_v11 }
  0xea   : > { %409 = vrcp.f32 %v295_v12 }
  0xf7   : > { %v410_v16 = vpop.eup %409 }
  0xf8   : > { %v301_v17 = vmul.f32 %v410_v16, %v300_v15 }
  0xfa   : > { %303 = vst.msk [vmem:[%s210_s11] sm:$0xff] %vm302_vm2, %v301_v17 }
  0xfb PF: > { %s15_s17 = sadd.s32 1, %s417_s17  }
  0xfc   : > { %p12_p4 = scmp.ge.s32.totalorder %s15_s17, 4  }
  0xfe   :  { %14 = sbr.rel (!%p12_p4) target bundleno = 2 (0x2), region = 69 }

</bundles_post_ra>
